<compile_context>
chip_gen: v5e
topology: v5e:2x2
jax: 0.10.0
libtpu: 0.0.40
codegen_flags: <defaults>
</compile_context>

<pallas_src>
import functools

import jax
import jax.numpy as jnp
from jax.experimental import pallas as pl
from jax.experimental.pallas import tpu as pltpu

IN_F, HID_F, OUT_F = 10, 20, 1
PACK = 8  # batch rows packed into one row of the reshaped (row-major) layout


def _round_up(n: int, m: int) -> int:
    return ((n + m - 1) // m) * m


def _block_diag(w, reps):
    """(k, n) -> (reps*k, reps*n) block-diagonal with `reps` copies of w."""
    k, n = w.shape
    out = jnp.zeros((reps, k, reps, n), w.dtype)
    idx = jnp.arange(reps)
    out = out.at[idx, :, idx, :].set(w)
    return out.reshape(reps * k, reps * n)


def mlp_kernel(x_ref, w1_ref, b1_ref, w2_ref, b2_ref, o_ref):
    # x_ref: (bm, 80)  -- 8 batch rows packed per sublane row (lane-dense DMA).
    # Layer 1 on the MXU: (bm,80)@(80,160) -> (bm,160), f32 accumulate.
    h = jnp.dot(x_ref[...], w1_ref[...], preferred_element_type=jnp.float32)
    h = jnp.maximum(h + b1_ref[...], 0.0)          # bias + ReLU on the VPU
    # Layer 2: (bm,160)@(160,8) -> (bm,8); block-diagonal w2e keeps rows packed.
    y = jnp.dot(h, w2_ref[...], preferred_element_type=jnp.float32)
    o_ref[...] = (y + b2_ref[...]).astype(o_ref.dtype)


@functools.partial(jax.jit, static_argnames=("block_b",))
def simple_model_forward(x, w1, b1, w2, b2, block_b: int = 8192):
    """Fused forward: relu(x @ w1 + b1) @ w2 + b2.

    x: (B, 10); w1: (10, 20); b1: (20,); w2: (20, 1); b2: (1,).  Returns (B, 1).
    """
    B, in_f = x.shape
    hid_f = w1.shape[1]
    out_f = w2.shape[1]

    # Pad only to a multiple of PACK (needed for the free row-major repack);
    # no full-tile jnp.pad -- the last grid block is handled by Pallas masking.
    b_pad = _round_up(B, PACK)
    if b_pad != B:
        x = jnp.pad(x, ((0, b_pad - B), (0, 0)))
    rows = b_pad // PACK
    x_p = x.reshape(rows, PACK * in_f)             # free reshape: 320 B DMA lines

    # Batch tile (in original rows): large for low grid-step overhead, but capped
    # at ~half the batch so v7x's two TensorCores both get grid steps.
    tb = max(1024, min(block_b, _round_up(pl.cdiv(b_pad, 2), 1024)))
    block_rows = min(tb // PACK, rows)             # multiple of 128, or == rows
    grid = pl.cdiv(rows, block_rows)

    # One-time expansion of the tiny parameters to the packed layout.
    w1e = _block_diag(w1, PACK)                                  # (80, 160)
    b1e = jnp.tile(b1.reshape(-1), PACK).reshape(1, PACK * hid_f)
    w2e = _block_diag(w2, PACK)                                  # (160, 8)
    b2e = jnp.tile(b2.reshape(-1), PACK).reshape(1, PACK * out_f)

    out_p = pl.pallas_call(
        mlp_kernel,
        out_shape=jax.ShapeDtypeStruct((rows, PACK * out_f), x.dtype),
        grid=(grid,),
        in_specs=[
            pl.BlockSpec((block_rows, PACK * in_f), lambda i: (i, 0)),   # x tiles
            pl.BlockSpec((PACK * in_f, PACK * hid_f), lambda i: (0, 0)),  # resident
            pl.BlockSpec((1, PACK * hid_f), lambda i: (0, 0)),
            pl.BlockSpec((PACK * hid_f, PACK * out_f), lambda i: (0, 0)),
            pl.BlockSpec((1, PACK * out_f), lambda i: (0, 0)),
        ],
        out_specs=pl.BlockSpec((block_rows, PACK * out_f), lambda i: (i, 0)),
        compiler_params=pltpu.CompilerParams(
            dimension_semantics=("parallel",),      # megacore split on v7x
        ),
    )(x_p, w1e, b1e, w2e, b2e)

    # (rows, 8*out_f) -> (B, out_f): free reshape + strip the <=7-row pad.
    return out_p.reshape(b_pad, out_f)[:B]


if __name__ == "__main__":
    key = jax.random.PRNGKey(0)
    k_w1, k_b1, k_w2, k_b2, *k_xs = jax.random.split(key, 8)

    # Deterministic nn.Linear-like parameters, stored as (in, out).
    w1 = jax.random.uniform(k_w1, (IN_F, HID_F), jnp.float32, -0.3, 0.3)
    b1 = jax.random.uniform(k_b1, (HID_F,), jnp.float32, -0.3, 0.3)
    w2 = jax.random.uniform(k_w2, (HID_F, OUT_F), jnp.float32, -0.2, 0.2)
    b2 = jax.random.uniform(k_b2, (OUT_F,), jnp.float32, -0.2, 0.2)

    def reference(xx):
        return jnp.maximum(xx @ w1 + b1[None, :], 0.0) @ w2 + b2[None, :]

    # Cases: tiny single block; B%8==0 full-block; multi-step grid with a
    # partial final block (boundary masking); B%8!=0 (pad path).
    cases = [(8, 8192), (1000, 8192), (3000, 1024), (37, 8192)]
    for (batch, bb), kx in zip(cases, k_xs):
        x = jax.random.normal(kx, (batch, IN_F), dtype=jnp.float32)
        out = simple_model_forward(x, w1, b1, w2, b2, block_b=bb)
        jax.block_until_ready(out)
        ref = reference(x)
        assert out.shape == (batch, OUT_F), out.shape
        err = float(jnp.max(jnp.abs(out - ref)))
        assert jnp.allclose(out, ref, atol=1e-4, rtol=1e-4), err

    print("KERNEL_OK")
</pallas_src>

<mosaic_0001>
module attributes {stable_mosaic.version = 11 : i64} {
  func.func @mlp_kernel(%arg0: i32, %arg1: memref<1x80xf32, #tpu.memory_space<vmem>>, %arg2: memref<80x160xf32, #tpu.memory_space<vmem>>, %arg3: memref<1x160xf32, #tpu.memory_space<vmem>>, %arg4: memref<160x8xf32, #tpu.memory_space<vmem>>, %arg5: memref<1x8xf32, #tpu.memory_space<vmem>>, %arg6: memref<1x8xf32, #tpu.memory_space<vmem>>) attributes {dimension_semantics = [#tpu.dimension_semantics<parallel>], iteration_bounds = array<i64: 1>, scalar_prefetch = 0 : i64, scratch_operands = 0 : i64, tpu.core_type = #tpu.core_type<tc>, window_params = [{transform_indices = @transform_0, window_bounds = array<i64: 1, 80>}, {pipeline_mode = #tpu.pipeline_mode<synchronous>, transform_indices = @transform_1, window_bounds = array<i64: 80, 160>}, {pipeline_mode = #tpu.pipeline_mode<synchronous>, transform_indices = @transform_2, window_bounds = array<i64: 1, 160>}, {pipeline_mode = #tpu.pipeline_mode<synchronous>, transform_indices = @transform_3, window_bounds = array<i64: 160, 8>}, {pipeline_mode = #tpu.pipeline_mode<synchronous>, transform_indices = @transform_4, window_bounds = array<i64: 1, 8>}, {transform_indices = @transform_5, window_bounds = array<i64: 1, 8>}]} {
    %c0 = arith.constant 0 : index
    %c0_0 = arith.constant 0 : index
    %0 = vector.load %arg1[%c0, %c0_0] : memref<1x80xf32, #tpu.memory_space<vmem>>, vector<1x80xf32>
    %c0_1 = arith.constant 0 : index
    %c0_2 = arith.constant 0 : index
    %1 = vector.load %arg2[%c0_1, %c0_2] : memref<80x160xf32, #tpu.memory_space<vmem>>, vector<80x160xf32>
    %cst = arith.constant dense<0.000000e+00> : vector<1x160xf32>
    %2 = tpu.matmul %0, %1, %cst {dimension_numbers = #tpu.dot_dimension_numbers<[1], [0], [0], [1], [0, 0, 1, 1], [], []>} : vector<1x80xf32>, vector<80x160xf32>, vector<1x160xf32> -> vector<1x160xf32>
    %c0_3 = arith.constant 0 : index
    %c0_4 = arith.constant 0 : index
    %3 = vector.load %arg3[%c0_3, %c0_4] : memref<1x160xf32, #tpu.memory_space<vmem>>, vector<1x160xf32>
    %4 = arith.addf %2, %3 : vector<1x160xf32>
    %cst_5 = arith.constant 0.000000e+00 : f32
    %5 = vector.broadcast %cst_5 : f32 to vector<1x160xf32>
    %6 = arith.maximumf %4, %5 : vector<1x160xf32>
    %c0_6 = arith.constant 0 : index
    %c0_7 = arith.constant 0 : index
    %7 = vector.load %arg4[%c0_6, %c0_7] : memref<160x8xf32, #tpu.memory_space<vmem>>, vector<160x8xf32>
    %cst_8 = arith.constant dense<0.000000e+00> : vector<1x8xf32>
    %8 = tpu.matmul %6, %7, %cst_8 {dimension_numbers = #tpu.dot_dimension_numbers<[1], [0], [0], [1], [0, 0, 1, 1], [], []>} : vector<1x160xf32>, vector<160x8xf32>, vector<1x8xf32> -> vector<1x8xf32>
    %c0_9 = arith.constant 0 : index
    %c0_10 = arith.constant 0 : index
    %9 = vector.load %arg5[%c0_9, %c0_10] : memref<1x8xf32, #tpu.memory_space<vmem>>, vector<1x8xf32>
    %10 = arith.addf %8, %9 : vector<1x8xf32>
    %c0_11 = arith.constant 0 : index
    %c0_12 = arith.constant 0 : index
    %11 = vector.load %arg6[%c0_11, %c0_12] : memref<1x8xf32, #tpu.memory_space<vmem>>, vector<1x8xf32>
    tpu.vector_store %arg6[%c0_11, %c0_12], %10 {strides = array<i32>} : memref<1x8xf32, #tpu.memory_space<vmem>>, vector<1x8xf32>,
    return
  }
  func.func @transform_0(%arg0: i32) -> (i32, i32) {
    %c0_i32 = arith.constant 0 : i32
    %c0_i32_0 = arith.constant 0 : i32
    return %arg0, %c0_i32 : i32, i32
  }
  func.func @transform_1(%arg0: i32) -> (i32, i32) {
    %c0_i32 = arith.constant 0 : i32
    %c0_i32_0 = arith.constant 0 : i32
    %c0_i32_1 = arith.constant 0 : i32
    return %c0_i32, %c0_i32_0 : i32, i32
  }
  func.func @transform_2(%arg0: i32) -> (i32, i32) {
    %c0_i32 = arith.constant 0 : i32
    %c0_i32_0 = arith.constant 0 : i32
    %c0_i32_1 = arith.constant 0 : i32
    return %c0_i32, %c0_i32_0 : i32, i32
  }
  func.func @transform_3(%arg0: i32) -> (i32, i32) {
    %c0_i32 = arith.constant 0 : i32
    %c0_i32_0 = arith.constant 0 : i32
    %c0_i32_1 = arith.constant 0 : i32
    return %c0_i32, %c0_i32_0 : i32, i32
  }
  func.func @transform_4(%arg0: i32) -> (i32, i32) {
    %c0_i32 = arith.constant 0 : i32
    %c0_i32_0 = arith.constant 0 : i32
    %c0_i32_1 = arith.constant 0 : i32
    return %c0_i32, %c0_i32_0 : i32, i32
  }
  func.func @transform_5(%arg0: i32) -> (i32, i32) {
    %c0_i32 = arith.constant 0 : i32
    %c0_i32_0 = arith.constant 0 : i32
    return %arg0, %c0_i32 : i32, i32
  }
}

</mosaic_0001>

<bundles_post_ra>
// kernel: tile.14
= control target key start
LH: loop header
LB: loop body
LE: loop exit
PB: predicated region body
PF: predicated region fallthrough
CT: control target
= control target key end

     0   :  { %vm9_vm0 = vcmask 64512   ;;  %s83_s12 = smov 120   ;;  %s84_s13 = smov 80   ;;  %vm3_vm1 = vcmask 162816   ;;  %vm13_vm2 = vcmask 97280   ;;  %vm16_vm3 = vcmask 1048512   ;;  %s133_s0 = inlined_call_operand.vmem [shape: f32[8,20], index: 0, kind: input, shape index: {}]   ;;  %s134_s1 = inlined_call_operand.vmem [shape: f32[1,160], index: 1, kind: output, shape index: {}]  }
   0x1   :  { %v67_v0 = vld [vmem:[%s133_s0 + $0x6] sm:$0x1]   ;;  %v70_v3 = vld [vmem:[%s133_s0 + $0x4] sm:$0x1]   ;;  %v72_v4 = vld [vmem:[%s133_s0 + $0x2] sm:$0x1]  }
   0x2   :  { %v68_v1 = vld [vmem:[%s133_s0 + $0x6] sm:$0x1]   ;;  %26 = vrot.lane.b32.xlu1 %v70_v3, %s84_s13  ;;  %s85_s16 = smov 40   ;;  %v69_v5 = vld [vmem:[%s133_s0 + $0x5] sm:$0x1]   ;;  %s86_s23 = smov 100  }
   0x3   :  { %v10_v2 = vsel %vm9_vm0, %v68_v1, %v67_v0  ;;  %38 = vrot.lane.b32.xlu2 %v72_v4, %s85_s16  ;;  %v71_v6 = vld [vmem:[%s133_s0 + $0x3] sm:$0x1]   ;;  %v73_v7 = vld [vmem:[%s133_s0 + $0x1] sm:$0x1]   ;;  %s87_s24 = smov 60   ;;  %s88_s25 = smov 20  }
   0x4   :  { %11 = vrot.lane.b32.xlu0 %v10_v2, %s83_s12  ;;  %v74_v8 = vld [vmem:[%s133_s0 + $0x7] sm:$0x1]   ;;  %s89_s28 = smov 12   ;;  %v2_v9 = vld [vmem:[%s133_s0] sm:$0x1]   ;;  %vm22_vm4 = vcmask 982816  }
   0x5   :  { %4 = vst.msk [vmem:[#allocation0] sm:$0x1] %vm3_vm1, %v2_v9   ;;  %vm28_vm5 = vcmask 818816   ;;  %vm34_vm6 = vcmask 654816   ;;  %vm40_vm7 = vcmask 490816   ;;  %vm46_vm8 = vcmask 326816  }
   0x6   :  { %vm52_vm9 = vcmask 261216  }
   0xa   :  { %32 = vrot.lane.b32.xlu1 %v71_v6, %s87_s24 }
   0xb   :  { %44 = vrot.lane.b32.xlu2 %v73_v7, %s88_s25 }
   0xc   :  { %20 = vrot.lane.b32.xlu0 %v69_v5, %s86_s23 }
  0x14   :  { %50 = vrot.lane.b32.xlu0 %v74_v8, %s89_s28 }
  0x5d   :  { %v39_v10 = vpop.permute.xlu2 %38  }
  0x65   :  { %v45_v11 = vpop.permute.xlu2 %44  }
  0x74   :  { %v27_v13 = vpop.permute.xlu1 %26  }
  0x76   :  { %v12_v12 = vpop.permute.xlu0 %11  }
  0x77   :  { %15 = vst.msk [vmem:[#allocation0 + $0x8] sm:$0x1] %vm13_vm2, %v12_v12  }
  0x78   :  { %17 = vst.msk [vmem:[#allocation0] sm:$0x1] %vm16_vm3, %v12_v12  }
  0x7c   :  { %v33_v15 = vpop.permute.xlu1 %32  }
  0x7e   :  { %v21_v14 = vpop.permute.xlu0 %20  }
  0x7f   :  { %23 = vst.msk [vmem:[#allocation0] sm:$0x1] %vm22_vm4, %v21_v14  }
  0x80   :  { %29 = vst.msk [vmem:[#allocation0] sm:$0x1] %vm28_vm5, %v27_v13  }
  0x81   :  { %35 = vst.msk [vmem:[#allocation0] sm:$0x1] %vm34_vm6, %v33_v15  }
  0x82   :  { %41 = vst.msk [vmem:[#allocation0] sm:$0x1] %vm40_vm7, %v39_v10  }
  0x83   :  { %47 = vst.msk [vmem:[#allocation0] sm:$0x1] %vm46_vm8, %v45_v11  }
  0x86   :  { %v51_v16 = vpop.permute.xlu0 %50  }
  0x87   :  { %54 = vst.msk [vmem:[#allocation0 + $0x8] sm:$0x1] %vm52_vm9, %v51_v16  }
  0x8a   :  { %v57_v17 = vld [vmem:[#allocation0] sm:$0x1] }
  0x8b   :  { %60 = vst [vmem:[%s134_s1] sm:$0x1] %v57_v17 }
  0x8e   :  { %v62_v18 = vld [vmem:[#allocation0 + $0x8] sm:$0x1] }
  0x8f   :  { %75 = vst [vmem:[%s134_s1 + $0x1] sm:$0x1] %v62_v18 }

// kernel: simple_model_forward.1
= control target key start
LH: loop header
LB: loop body
LE: loop exit
PB: predicated region body
PF: predicated region fallthrough
CT: control target
= control target key end

     0   :  { %s370_s0 = inlined_call_operand.vmem [shape: f32[1,80], index: 0, kind: input, shape index: {}]   ;;  %s371_s1 = inlined_call_operand.vmem [shape: f32[80,160], index: 1, kind: input, shape index: {}]   ;;  %s372_s2 = inlined_call_operand.vmem [shape: f32[1,160], index: 2, kind: input, shape index: {}]   ;;  %s373_s3 = inlined_call_operand.vmem [shape: f32[160,8], index: 3, kind: input, shape index: {}]   ;;  %s374_s4 = inlined_call_operand.vmem [shape: f32[1,8], index: 4, kind: input, shape index: {}]   ;;  %s375_s5 = inlined_call_operand.hbm [shape: f32[1,8], index: 5, kind: output, shape index: {}]  }
   0x1   :  { %v40_v0 = vld [vmem:[%s371_s1 + $0x90] sm:$0xff]  ;;  %v38_v1 = vld [vmem:[%s371_s1 + $0x80] sm:$0xff]  ;;  %v41_v2 = vld [vmem:[%s371_s1 + $0x98] sm:$0xff] }
   0x2   :  { %58 = vmatpush.msra.mxu0 %v40_v0  ;;  %78 = vmatpush.msra.mxu1 %v41_v2  ;;  %v39_v3 = vld [vmem:[%s371_s1 + $0x88] sm:$0xff]  ;;  %v36_v4 = vld [vmem:[%s371_s1 + $0x70] sm:$0xff]  ;;  %v37_v5 = vld [vmem:[%s371_s1 + $0x78] sm:$0xff] }
   0x3   :  { %v34_v6 = vld [vmem:[%s371_s1 + $0x60] sm:$0xff]  ;;  %v35_v7 = vld [vmem:[%s371_s1 + $0x68] sm:$0xff]  ;;  %v32_v8 = vld [vmem:[%s371_s1 + $0x50] sm:$0xff] }
   0x4   :  { %59 = vmatpush.msra.mxu0 %v38_v1  ;;  %79 = vmatpush.msra.mxu1 %v39_v3  ;;  %v33_v9 = vld [vmem:[%s371_s1 + $0x58] sm:$0xff]  ;;  %v108_v11 = vld [vmem:[%s373_s3 + $0x70] sm:$0xff]  ;;  %v30_v12 = vld [vmem:[%s371_s1 + $0x40] sm:$0xff] }
   0x5   :  { %v109_v10 = vld [vmem:[%s373_s3 + $0x78] sm:$0xff]  ;;  %v31_v13 = vld [vmem:[%s371_s1 + $0x48] sm:$0xff]  ;;  %v28_v15 = vld [vmem:[%s371_s1 + $0x30] sm:$0xff] }
   0x6   :  { %60 = vmatpush.msra.mxu0 %v36_v4  ;;  %80 = vmatpush.msra.mxu1 %v37_v5  ;;  %v107_v14 = vld [vmem:[%s373_s3 + $0x68] sm:$0xff]  ;;  %v29_v16 = vld [vmem:[%s371_s1 + $0x38] sm:$0xff]  ;;  %v106_v17 = vld [vmem:[%s373_s3 + $0x60] sm:$0xff] }
   0x7   :  { %119 = vmatpush.msra.mxu2 %v109_v10 }
   0x8   :  { %61 = vmatpush.msra.mxu0 %v34_v6  ;;  %81 = vmatpush.msra.mxu1 %v35_v7 }
   0x9   :  { %120 = vmatpush.msra.mxu2 %v108_v11 }
   0xa   :  { %62 = vmatpush.msra.mxu0 %v32_v8  ;;  %82 = vmatpush.msra.mxu1 %v33_v9 }
   0xc   :  { %63 = vmatpush.msra.mxu0 %v30_v12  ;;  %83 = vmatpush.msra.mxu1 %v31_v13 }
   0xd   :  { %10 = vsyncpa [#allocation3], 0  ;;  %v26_v18 = vld [vmem:[%s371_s1 + $0x20] sm:$0xff]  ;;  %v27_v19 = vld [vmem:[%s371_s1 + $0x28] sm:$0xff]  ;;  %121 = vmatpush.msra.mxu2 %v107_v14  ;;  %vm48_vm0 = vcmask 654336   ;;  %vm115_vm1 = vcmask 261120  }
   0xe   :  { %64 = vmatpush.msra.mxu0 %v28_v15  ;;  %84 = vmatpush.msra.mxu1 %v29_v16  ;;  %v105_v20 = vld [vmem:[%s373_s3 + $0x58] sm:$0xff]  ;;  %v24_v21 = vld [vmem:[%s371_s1 + $0x10] sm:$0xff]  ;;  %v22_v24 = vld [vmem:[%s371_s1] sm:$0xff]  ;;  %s168_s27 = sshll.u32 %s375_s5, 4  ;;  %vm159_vm2 = vcmask 57344   ;;  %s169_s27 = int_to_ptr.hbm [resolvable:$true] %s168_s27 }
   0xf   :  { %v25_v22 = vld [vmem:[%s371_s1 + $0x18] sm:$0xff]  ;;  %122 = vmatpush.msra.mxu2 %v106_v17  ;;  %v104_v23 = vld [vmem:[%s373_s3 + $0x50] sm:$0xff]  ;;  %v23_v25 = vld [vmem:[%s371_s1 + $0x8] sm:$0xff] }
  0x10   :  { %65 = vmatpush.msra.mxu0 %v26_v18  ;;  %85 = vmatpush.msra.mxu1 %v27_v19  ;;  %v21_v26 = vld [vmem:[%s370_s0] sm:$0x1]  ;;  %v103_v27 = vld [vmem:[%s373_s3 + $0x48] sm:$0xff]  ;;  %v101_v29 = vld [vmem:[%s373_s3 + $0x38] sm:$0xff] }
  0x11   :  { %123 = vmatpush.msra.mxu2 %v105_v20  ;;  %v102_v28 = vld [vmem:[%s373_s3 + $0x40] sm:$0xff]  ;;  %v100_v30 = vld [vmem:[%s373_s3 + $0x30] sm:$0xff]  ;;  %v99_v31 = vld [vmem:[%s373_s3 + $0x28] sm:$0xff] }
  0x12   :  { %66 = vmatpush.msra.mxu0 %v24_v21  ;;  %86 = vmatpush.msra.mxu1 %v25_v22  ;;  %v98_v32 = vld [vmem:[%s373_s3 + $0x20] sm:$0xff]  ;;  %v97_v33 = vld [vmem:[%s373_s3 + $0x18] sm:$0xff]  ;;  %v96_v34 = vld [vmem:[%s373_s3 + $0x10] sm:$0xff] }
  0x13   :  { %124 = vmatpush.msra.mxu2 %v104_v23  ;;  %v113_v35 = vld [vmem:[%s373_s3 + $0x98] sm:$0xff]  ;;  %v95_v36 = vld [vmem:[%s373_s3 + $0x8] sm:$0xff]  ;;  %v112_v37 = vld [vmem:[%s373_s3 + $0x90] sm:$0xff] }
  0x14   :  { %67 = vmatpush.msra.mxu0 %v22_v24  ;;  %87 = vmatpush.msra.mxu1 %v23_v25  ;;  %v94_v38 = vld [vmem:[%s373_s3] sm:$0xff]  ;;  %v111_v39 = vld [vmem:[%s373_s3 + $0x88] sm:$0xff] }
  0x15   :  { %177 = vmatmul.msk.f32.vlgmr.msra.gmra.mxu0 %vm48_vm0, %v21_v26  ;;  %178 = vmatmul.msk.f32.vlgmr.msra.gmra.mxu1 %vm48_vm0, %v21_v26  ;;  %v110_v40 = vld [vmem:[%s373_s3 + $0x80] sm:$0xff]  ;;  %s207_s3 = smov [#allocation2]  }
  0x16   :  { %125 = vmatpush.msra.mxu2 %v103_v27  ;;  %151 = vmatpush.msra.mxu3 %v113_v35  ;;  %v42_v41 = vld [vmem:[%s372_s2] sm:$0x3]  ;;  %s166_s26 = sshll.u32 %s207_s3, 4  ;;  %s167_s26 = int_to_ptr.vmem [resolvable:$true] %s166_s26 }
  0x17   :  { %v44_v42 = vperm.slane %v42_v41, 0  ;;  %v45_v43 = vperm.slane %v42_v41, 1  ;;  %v114_v50 = vld [vmem:[%s374_s4] sm:$0x1] }
  0x18   :  { %126 = vmatpush.msra.mxu2 %v102_v28  ;;  %152 = vmatpush.msra.mxu3 %v112_v37 }
  0x1a   :  { %127 = vmatpush.msra.mxu2 %v101_v29  ;;  %153 = vmatpush.msra.mxu3 %v111_v39 }
  0x1c   :  { %128 = vmatpush.msra.mxu2 %v100_v30  ;;  %154 = vmatpush.msra.mxu3 %v110_v40 }
  0x1e   :  { %129 = vmatpush.msra.mxu2 %v99_v31 }
  0x20   :  { %130 = vmatpush.msra.mxu2 %v98_v32 }
  0x22   :  { %131 = vmatpush.msra.mxu2 %v97_v33 }
  0x24   :  { %132 = vmatpush.msra.mxu2 %v96_v34 }
  0x26   :  { %133 = vmatpush.msra.mxu2 %v95_v36 }
  0x28   :  { %134 = vmatpush.msra.mxu2 %v94_v38 }
  0x92   :  { %v69_v44 = vpop.f32.mrf.mxu0  ;;  %v89_v45 = vpop.f32.mrf.mxu1 }
  0x93   :  { %v70_v46 = vadd.f32 %v69_v44, %v44_v42  ;;  %v90_v47 = vadd.f32 %v89_v45, %v45_v43 }
  0x95   :  { %v92_v48 = vmax.f32 %v70_v46, 0.0  ;;  %v93_v49 = vmax.f32 %v90_v47, 0.0 }
  0x97   :  { %135 = vmatmul.f32.vlgmr.msra.gmra.mxu2 %v92_v48  ;;  %179 = vmatmul.msk.f32.vlgmr.msra.gmra.mxu3 %vm115_vm1, %v93_v49 }
 0x11a   :  { %v136_v51 = vpop.f32.mrf.mxu2  ;;  %v156_v52 = vpop.f32.mrf.mxu3 }
 0x11b   :  { %v137_v53 = vadd.f32 %v136_v51, %v114_v50 }
 0x11d   :  { %v157_v54 = vadd.f32 %v156_v52, %v137_v53 }
 0x11f   :  { %160 = vst.msk [vmem:[#allocation2] sm:$0x1] %vm159_vm2, %v157_v54 }
 0x120   :  { %171 = dma.vmem_to_hbm [thread:$0]  %s167_s26, 16, %s169_s27, [#allocation3]  }
 0x121   :  { %205 = dma.done.wait [#allocation3], 16  }
 0x122   :  { %206 = vsyncadd [#allocation3], 4294967280 }
 0x123   :  { %176 = vsyncpa [#allocation3], 1 }

</bundles_post_ra>
